<compile_context>
chip_gen: v5e
topology: v5e:2x2
jax: 0.10.0
libtpu: 0.0.40
codegen_flags: <defaults>
</compile_context>

<pallas_src>
import functools

import jax
import jax.numpy as jnp
from jax.experimental import pallas as pl
from jax.experimental.pallas import tpu as pltpu


def _round_up(x, m):
    return ((x + m - 1) // m) * m


# ---------------------------------------------------------------------------
# Kernel
# ---------------------------------------------------------------------------
def classifier_cnn_kernel(x_ref, wc_ref, w1_ref, b1_ref, w2_ref, b2_ref,
                          wo_ref, bo_ref, out_ref, *, lout):
    """One batch tile of the full forward pass.

    x_ref  : (TB, Lp, E)   bf16  embedded tokens incl. zero halo (Lp = lout + 4)
    wc_ref : (5*E, HPAD)   bf16  fused im2col conv weight (row = tap*E + e)
    w1,w2  : (HPAD, HPAD)  bf16 ; b1,b2 : (1, HPAD) f32
    wo     : (HPAD, CPAD)  bf16 ; bo    : (1, CPAD) f32
    out_ref: (TB, CPAD)    f32
    """
    x = x_ref[...]                                  # loaded once per grid step
    tb, _, e = x.shape
    hpad = wc_ref.shape[-1]

    # im2col: lane-concat the 5 shifted time windows and flatten (batch, time)
    # so the whole fused conv is ONE MXU matmul with K = 5*E.  The MXU
    # accumulates over the taps; no per-tap f32 VPU adds, no per-tap
    # (tb, lout, H) materializations.  lout % 16 == 0 keeps the reshape
    # tile-aligned for bf16.
    slab = jnp.concatenate([x[:, k:k + lout, :] for k in range(5)], axis=-1)
    conv = jnp.dot(slab.reshape(tb * lout, 5 * e), wc_ref[...],
                   preferred_element_type=jnp.float32)      # (tb*lout, HPAD)
    conv = conv.reshape(tb, lout, hpad)

    # Time-max then ReLU  (== torch.max(conv_k(x), dim=2) -> concat -> ReLU;
    # extra halo/tail positions and padded channels are exact zeros).
    # TODO(synk): on v6e/v7x the max/ReLU could run in bf16 (gate on chip
    # generation); kept f32 so the same kernel works on v5e's f32-only VPU.
    h = jnp.maximum(jnp.max(conv, axis=1), 0.0)             # (tb, HPAD) f32

    # TODO(synk): nn.Dropout layers are identity here (eval-mode forward).
    h = jnp.dot(h.astype(jnp.bfloat16), w1_ref[...],
                preferred_element_type=jnp.float32) + b1_ref[...]
    h = jnp.maximum(h, 0.0)
    h = jnp.dot(h.astype(jnp.bfloat16), w2_ref[...],
                preferred_element_type=jnp.float32) + b2_ref[...]
    h = jnp.maximum(h, 0.0)
    out = jnp.dot(h.astype(jnp.bfloat16), wo_ref[...],
                  preferred_element_type=jnp.float32) + bo_ref[...]
    out_ref[...] = out                       # lane-dense (CPAD) unmasked store


# ---------------------------------------------------------------------------
# Parameter init / packing
# ---------------------------------------------------------------------------
def init_params(key, vocab_size, embed_size, num_classes):
    """Random params matching the PyTorch module's layer shapes / inits."""
    each_out = embed_size // 3
    hidden = each_out * 3
    ks = jax.random.split(key, 10)
    # nn.init.uniform_(embed.weight, -0.25, 0.25) overwrites the padding_idx
    # row too, so there is no guaranteed zero row in the real table.
    embed = jax.random.uniform(ks[0], (vocab_size, embed_size),
                               minval=-0.25, maxval=0.25, dtype=jnp.float32)

    def conv_w(k, K):
        fan_in = embed_size * K
        bound = 1.0 / float(fan_in) ** 0.5
        return jax.random.uniform(k, (K, embed_size, each_out),
                                  minval=-bound, maxval=bound, dtype=jnp.float32)

    def lin(kw, kb, fin, fout):
        bound = 1.0 / float(fin) ** 0.5
        w = jax.random.uniform(kw, (fin, fout), minval=-bound, maxval=bound,
                               dtype=jnp.float32)
        b = jax.random.uniform(kb, (1, fout), minval=-bound, maxval=bound,
                               dtype=jnp.float32)
        return w, b

    w3 = conv_w(ks[1], 3)
    w4 = conv_w(ks[2], 4)
    w5 = conv_w(ks[3], 5)
    w1, b1 = lin(ks[4], ks[5], hidden, hidden)
    w2, b2 = lin(ks[6], ks[7], hidden, hidden)
    wo, bo = lin(ks[8], ks[9], hidden, num_classes)
    return dict(embed=embed, w3=w3, w4=w4, w5=w5,
                w1=w1, b1=b1, w2=w2, b2=b2, wo=wo, bo=bo)


def pack_params(params):
    """One-time packing: fuse + im2col the conv branches, zero-pad hidden and
    class dims to 128-lane multiples, append a zero embedding row for the halo,
    and cast all matmul operands to bf16."""
    embed_size = params['embed'].shape[-1]
    each = embed_size // 3
    hidden = 3 * each
    num_classes = params['wo'].shape[-1]
    hpad = _round_up(hidden, 128)
    cpad = _round_up(num_classes, 128)

    # Fused (5, E, HPAD) conv weight aligned to the shared +/-4 halo:
    #   k=3 (padding=2) lives in taps 2..4, k=4 (padding=3) in taps 1..4,
    #   k=5 (padding=4) in taps 0..4.  Channel order matches the torch concat.
    # Exact only because bias=False and ReLU follows the time-max.
    wc = jnp.zeros((5, embed_size, hpad), jnp.float32)
    wc = wc.at[2:, :, 0:each].set(params['w3'])
    wc = wc.at[1:, :, each:2 * each].set(params['w4'])
    wc = wc.at[:, :, 2 * each:hidden].set(params['w5'])
    wc = wc.reshape(5 * embed_size, hpad)          # im2col row = tap*E + e

    def pad2(w, rows, cols):
        out = jnp.zeros((rows, cols), w.dtype)
        return out.at[:w.shape[0], :w.shape[1]].set(w)

    w1 = pad2(params['w1'], hpad, hpad); b1 = pad2(params['b1'], 1, hpad)
    w2 = pad2(params['w2'], hpad, hpad); b2 = pad2(params['b2'], 1, hpad)
    wo = pad2(params['wo'], hpad, cpad); bo = pad2(params['bo'], 1, cpad)

    # All-zero row at index vocab_size used as the halo pad id -> the halo
    # comes straight out of the gather, no separate jnp.pad HBM pass.
    embed = jnp.concatenate(
        [params['embed'], jnp.zeros((1, embed_size), jnp.float32)], axis=0)

    return dict(
        embed=embed.astype(jnp.bfloat16),
        wconv=wc.astype(jnp.bfloat16),
        w1=w1.astype(jnp.bfloat16), b1=b1,
        w2=w2.astype(jnp.bfloat16), b2=b2,
        wo=wo.astype(jnp.bfloat16), bo=bo,
    )


# ---------------------------------------------------------------------------
# VMEM-aware tiling
# ---------------------------------------------------------------------------
def _vmem_capacity_bytes():
    """Physical VMEM per TensorCore (generation-aware); conservative fallback."""
    try:
        info = pltpu.get_tpu_info()
        cap = int(getattr(info, "vmem_capacity_bytes", 0))
        if cap > 0:
            return cap
    except Exception:
        pass
    return 64 << 20        # v7x per-TC VMEM: smallest across v5e/v6e/v7x


def _per_row_vmem_bytes(Lp, lout, E, HPAD, CPAD):
    """VMEM bytes per batch row with (sublane, lane) layout padding:
    bf16 tiles are (16, 128), f32 tiles are (8, 128)."""
    lanes_e = _round_up(E, 128)
    lanes_f = _round_up(5 * E, 128)
    x_row    = 2 * _round_up(Lp, 16) * lanes_e * 2    # bf16 input, double-buffered
    slab_row = 2 * _round_up(lout, 16) * lanes_f * 2  # shifted slices + concat slab
    conv_row = _round_up(lout, 8) * HPAD * 4          # f32 conv matmul result
    out_row  = 2 * _round_up(CPAD, 128) * 4           # f32 output, double-buffered
    return x_row + slab_row + conv_row + out_row


def _weight_vmem_bytes(E, HPAD, CPAD):
    wc = _round_up(5 * E, 16) * HPAD * 2
    w  = 2 * HPAD * HPAD * 2 + HPAD * CPAD * 2
    b  = 3 * 8 * max(HPAD, CPAD) * 4
    return 2 * (wc + w + b)            # pipeline double-buffers every input


def _choose_tile_b(B, Lp, lout, E, HPAD, CPAD):
    """Largest batch tile that fits this generation's VMEM (layout-aware
    accounting), capped so batches >= 16 give >= 2 grid steps (both v7x TCs)."""
    cap = _vmem_capacity_bytes()
    vmem_limit = int(cap * 0.85)
    budget = int(cap * 0.70) - _weight_vmem_bytes(E, HPAD, CPAD)
    per_row = _per_row_vmem_bytes(Lp, lout, E, HPAD, CPAD)
    tb = max(1, budget // per_row)
    if B >= 16:
        tb = min(tb, _round_up(-(-B // 2), 8))   # >= 2 grid steps (megacore)
    if tb >= B:
        return B, vmem_limit
    return max(8, (tb // 8) * 8), vmem_limit


# ---------------------------------------------------------------------------
# Forward pass
# ---------------------------------------------------------------------------
@functools.partial(jax.jit, static_argnames=("num_classes",))
def classifier_cnn_forward(input_ids, packed, *, num_classes):
    B, L = input_ids.shape
    E = packed['embed'].shape[-1]
    pad_id = packed['embed'].shape[0] - 1          # appended all-zero row
    HPAD = packed['w1'].shape[0]
    CPAD = packed['wo'].shape[-1]
    HALO = 4                                       # k=5 / padding=4 halo
    lout = _round_up(L + HALO, 16)                 # conv output length, tile-aligned
    Lp = lout + HALO                               # padded input length

    # Halo comes straight out of the gather (zero embedding row); padding the
    # int32 ids is ~50x cheaper in HBM bytes than padding the embedded tensor.
    ids = jnp.pad(input_ids, ((0, 0), (HALO, Lp - HALO - L)),
                  constant_values=pad_id)
    # TODO(synk): for large vocab/batch, move this gather in-kernel
    # (PrefetchScalarGridSpec ids + memory_space=pl.ANY table + per-row DMA).
    x = jnp.take(packed['embed'], ids, axis=0)     # (B, Lp, E) bf16

    tile_b, vmem_limit = _choose_tile_b(B, Lp, lout, E, HPAD, CPAD)
    grid = (pl.cdiv(B, tile_b),)

    kernel = functools.partial(classifier_cnn_kernel, lout=lout)
    in_specs = [
        pl.BlockSpec((tile_b, Lp, E), lambda i: (i, 0, 0)),   # activations: batch-tiled
        pl.BlockSpec((5 * E, HPAD), lambda i: (0, 0)),        # weights: resident
        pl.BlockSpec((HPAD, HPAD), lambda i: (0, 0)),
        pl.BlockSpec((1, HPAD), lambda i: (0, 0)),
        pl.BlockSpec((HPAD, HPAD), lambda i: (0, 0)),
        pl.BlockSpec((1, HPAD), lambda i: (0, 0)),
        pl.BlockSpec((HPAD, CPAD), lambda i: (0, 0)),
        pl.BlockSpec((1, CPAD), lambda i: (0, 0)),
    ]
    out_specs = pl.BlockSpec((tile_b, CPAD), lambda i: (i, 0))

    out = pl.pallas_call(
        kernel,
        out_shape=jax.ShapeDtypeStruct((B, CPAD), jnp.float32),
        grid=grid,
        in_specs=in_specs,
        out_specs=out_specs,
        compiler_params=pltpu.CompilerParams(
            dimension_semantics=("parallel",),     # megacore sharding on v7x
            vmem_limit_bytes=vmem_limit),
    )(x, packed['wconv'], packed['w1'], packed['b1'],
      packed['w2'], packed['b2'], packed['wo'], packed['bo'])
    return out[:, :num_classes]


# ---------------------------------------------------------------------------
# Pure-JAX reference (original per-branch formulation, f32)
# ---------------------------------------------------------------------------
def reference_forward(input_ids, params):
    emb = jnp.take(params['embed'], input_ids, axis=0)          # (B, L, E) f32
    L = emb.shape[1]

    def branch(w):                                              # w: (K, E, O)
        K = w.shape[0]
        xp = jnp.pad(emb, ((0, 0), (K - 1, K - 1), (0, 0)))
        lo = L + K - 1
        acc = sum(jnp.einsum('ble,eo->blo', xp[:, k:k + lo, :], w[k])
                  for k in range(K))
        return jnp.max(acc, axis=1)

    h = jnp.concatenate([branch(params['w3']), branch(params['w4']),
                         branch(params['w5'])], axis=1)
    h = jax.nn.relu(h)
    h = jax.nn.relu(h @ params['w1'] + params['b1'])
    h = jax.nn.relu(h @ params['w2'] + params['b2'])
    return h @ params['wo'] + params['bo']


if __name__ == "__main__":
    vocab_size = 50
    embed_size = 48          # each_out_size = 16, output_size = 48
    num_classes = 5
    batch = 2
    seq_len = 16

    root = jax.random.PRNGKey(0)
    k_params, k_ids = jax.random.split(root)
    params = init_params(k_params, vocab_size, embed_size, num_classes)
    packed = pack_params(params)
    input_ids = jax.random.randint(k_ids, (batch, seq_len), 0, vocab_size,
                                   dtype=jnp.int32)

    logits = classifier_cnn_forward(input_ids, packed, num_classes=num_classes)
    jax.block_until_ready(logits)
    assert logits.shape == (batch, num_classes), logits.shape

    ref = reference_forward(input_ids, params)
    assert jnp.allclose(logits, ref, atol=5e-2, rtol=5e-2), (
        "kernel / reference mismatch")

    print("KERNEL_OK")
</pallas_src>

<mosaic_0001>
module attributes {stable_mosaic.version = 11 : i64} {
  func.func @classifier_cnn_kernel(%arg0: i32, %arg1: memref<2x36x48xbf16, #tpu.memory_space<vmem>>, %arg2: memref<240x128xbf16, #tpu.memory_space<vmem>>, %arg3: memref<128x128xbf16, #tpu.memory_space<vmem>>, %arg4: memref<1x128xf32, #tpu.memory_space<vmem>>, %arg5: memref<128x128xbf16, #tpu.memory_space<vmem>>, %arg6: memref<1x128xf32, #tpu.memory_space<vmem>>, %arg7: memref<128x128xbf16, #tpu.memory_space<vmem>>, %arg8: memref<1x128xf32, #tpu.memory_space<vmem>>, %arg9: memref<2x128xf32, #tpu.memory_space<vmem>>) attributes {dimension_semantics = [#tpu.dimension_semantics<parallel>], iteration_bounds = array<i64: 1>, scalar_prefetch = 0 : i64, scratch_operands = 0 : i64, tpu.core_type = #tpu.core_type<tc>, window_params = [{transform_indices = @transform_0, window_bounds = array<i64: 2, 36, 48>}, {pipeline_mode = #tpu.pipeline_mode<synchronous>, transform_indices = @transform_1, window_bounds = array<i64: 240, 128>}, {pipeline_mode = #tpu.pipeline_mode<synchronous>, transform_indices = @transform_2, window_bounds = array<i64: 128, 128>}, {pipeline_mode = #tpu.pipeline_mode<synchronous>, transform_indices = @transform_3, window_bounds = array<i64: 1, 128>}, {pipeline_mode = #tpu.pipeline_mode<synchronous>, transform_indices = @transform_4, window_bounds = array<i64: 128, 128>}, {pipeline_mode = #tpu.pipeline_mode<synchronous>, transform_indices = @transform_5, window_bounds = array<i64: 1, 128>}, {pipeline_mode = #tpu.pipeline_mode<synchronous>, transform_indices = @transform_6, window_bounds = array<i64: 128, 128>}, {pipeline_mode = #tpu.pipeline_mode<synchronous>, transform_indices = @transform_7, window_bounds = array<i64: 1, 128>}, {transform_indices = @transform_8, window_bounds = array<i64: 2, 128>}]} {
    %c0 = arith.constant 0 : index
    %c0_0 = arith.constant 0 : index
    %c0_1 = arith.constant 0 : index
    %0 = vector.load %arg1[%c0, %c0_0, %c0_1] : memref<2x36x48xbf16, #tpu.memory_space<vmem>>, vector<2x36x48xbf16>
    %1 = vector.extract_strided_slice %0 {offsets = [0, 0, 0], sizes = [2, 32, 48], strides = [1, 1, 1]} : vector<2x36x48xbf16> to vector<2x32x48xbf16>
    %2 = vector.extract_strided_slice %0 {offsets = [0, 1, 0], sizes = [2, 32, 48], strides = [1, 1, 1]} : vector<2x36x48xbf16> to vector<2x32x48xbf16>
    %3 = vector.extract_strided_slice %0 {offsets = [0, 2, 0], sizes = [2, 32, 48], strides = [1, 1, 1]} : vector<2x36x48xbf16> to vector<2x32x48xbf16>
    %4 = vector.extract_strided_slice %0 {offsets = [0, 3, 0], sizes = [2, 32, 48], strides = [1, 1, 1]} : vector<2x36x48xbf16> to vector<2x32x48xbf16>
    %5 = vector.extract_strided_slice %0 {offsets = [0, 4, 0], sizes = [2, 32, 48], strides = [1, 1, 1]} : vector<2x36x48xbf16> to vector<2x32x48xbf16>
    %6 = tpu.concatenate %1, %2, %3, %4, %5 in 2 : vector<2x32x48xbf16>, vector<2x32x48xbf16>, vector<2x32x48xbf16>, vector<2x32x48xbf16>, vector<2x32x48xbf16> -> vector<2x32x240xbf16>
    %7 = vector.shape_cast %6 : vector<2x32x240xbf16> to vector<64x240xbf16>
    %c0_2 = arith.constant 0 : index
    %c0_3 = arith.constant 0 : index
    %8 = vector.load %arg2[%c0_2, %c0_3] : memref<240x128xbf16, #tpu.memory_space<vmem>>, vector<240x128xbf16>
    %cst = arith.constant dense<0.000000e+00> : vector<64x128xf32>
    %9 = tpu.matmul %7, %8, %cst {dimension_numbers = #tpu.dot_dimension_numbers<[1], [0], [0], [1], [0, 0, 1, 1], [], []>} : vector<64x240xbf16>, vector<240x128xbf16>, vector<64x128xf32> -> vector<64x128xf32>
    %10 = vector.shape_cast %9 : vector<64x128xf32> to vector<2x32x128xf32>
    %cst_4 = arith.constant dense<0xFF800000> : vector<2x128xf32>
    %11 = vector.multi_reduction <maximumf>, %10, %cst_4 [1] : vector<2x32x128xf32> to vector<2x128xf32>
    %cst_5 = arith.constant 0.000000e+00 : f32
    %12 = vector.broadcast %cst_5 : f32 to vector<2x128xf32>
    %13 = arith.maximumf %11, %12 : vector<2x128xf32>
    %14 = arith.truncf %13 : vector<2x128xf32> to vector<2x128xbf16>
    %c0_6 = arith.constant 0 : index
    %c0_7 = arith.constant 0 : index
    %15 = vector.load %arg3[%c0_6, %c0_7] : memref<128x128xbf16, #tpu.memory_space<vmem>>, vector<128x128xbf16>
    %cst_8 = arith.constant dense<0.000000e+00> : vector<2x128xf32>
    %16 = tpu.matmul %14, %15, %cst_8 {dimension_numbers = #tpu.dot_dimension_numbers<[1], [0], [0], [1], [0, 0, 1, 1], [], []>} : vector<2x128xbf16>, vector<128x128xbf16>, vector<2x128xf32> -> vector<2x128xf32>
    %c0_9 = arith.constant 0 : index
    %c0_10 = arith.constant 0 : index
    %17 = vector.load %arg4[%c0_9, %c0_10] : memref<1x128xf32, #tpu.memory_space<vmem>>, vector<1x128xf32>
    %18 = vector.broadcast %17 : vector<1x128xf32> to vector<2x128xf32>
    %19 = arith.addf %16, %18 : vector<2x128xf32>
    %cst_11 = arith.constant 0.000000e+00 : f32
    %20 = vector.broadcast %cst_11 : f32 to vector<2x128xf32>
    %21 = arith.maximumf %19, %20 : vector<2x128xf32>
    %22 = arith.truncf %21 : vector<2x128xf32> to vector<2x128xbf16>
    %c0_12 = arith.constant 0 : index
    %c0_13 = arith.constant 0 : index
    %23 = vector.load %arg5[%c0_12, %c0_13] : memref<128x128xbf16, #tpu.memory_space<vmem>>, vector<128x128xbf16>
    %cst_14 = arith.constant dense<0.000000e+00> : vector<2x128xf32>
    %24 = tpu.matmul %22, %23, %cst_14 {dimension_numbers = #tpu.dot_dimension_numbers<[1], [0], [0], [1], [0, 0, 1, 1], [], []>} : vector<2x128xbf16>, vector<128x128xbf16>, vector<2x128xf32> -> vector<2x128xf32>
    %c0_15 = arith.constant 0 : index
    %c0_16 = arith.constant 0 : index
    %25 = vector.load %arg6[%c0_15, %c0_16] : memref<1x128xf32, #tpu.memory_space<vmem>>, vector<1x128xf32>
    %26 = vector.broadcast %25 : vector<1x128xf32> to vector<2x128xf32>
    %27 = arith.addf %24, %26 : vector<2x128xf32>
    %cst_17 = arith.constant 0.000000e+00 : f32
    %28 = vector.broadcast %cst_17 : f32 to vector<2x128xf32>
    %29 = arith.maximumf %27, %28 : vector<2x128xf32>
    %30 = arith.truncf %29 : vector<2x128xf32> to vector<2x128xbf16>
    %c0_18 = arith.constant 0 : index
    %c0_19 = arith.constant 0 : index
    %31 = vector.load %arg7[%c0_18, %c0_19] : memref<128x128xbf16, #tpu.memory_space<vmem>>, vector<128x128xbf16>
    %cst_20 = arith.constant dense<0.000000e+00> : vector<2x128xf32>
    %32 = tpu.matmul %30, %31, %cst_20 {dimension_numbers = #tpu.dot_dimension_numbers<[1], [0], [0], [1], [0, 0, 1, 1], [], []>} : vector<2x128xbf16>, vector<128x128xbf16>, vector<2x128xf32> -> vector<2x128xf32>
    %c0_21 = arith.constant 0 : index
    %c0_22 = arith.constant 0 : index
    %33 = vector.load %arg8[%c0_21, %c0_22] : memref<1x128xf32, #tpu.memory_space<vmem>>, vector<1x128xf32>
    %34 = vector.broadcast %33 : vector<1x128xf32> to vector<2x128xf32>
    %35 = arith.addf %32, %34 : vector<2x128xf32>
    %c0_23 = arith.constant 0 : index
    %c0_24 = arith.constant 0 : index
    %36 = vector.load %arg9[%c0_23, %c0_24] : memref<2x128xf32, #tpu.memory_space<vmem>>, vector<2x128xf32>
    tpu.vector_store %arg9[%c0_23, %c0_24], %35 {strides = array<i32>} : memref<2x128xf32, #tpu.memory_space<vmem>>, vector<2x128xf32>,
    return
  }
  func.func @transform_0(%arg0: i32) -> (i32, i32, i32) {
    %c0_i32 = arith.constant 0 : i32
    %c0_i32_0 = arith.constant 0 : i32
    %c0_i32_1 = arith.constant 0 : i32
    return %arg0, %c0_i32, %c0_i32_0 : i32, i32, i32
  }
  func.func @transform_1(%arg0: i32) -> (i32, i32) {
    %c0_i32 = arith.constant 0 : i32
    %c0_i32_0 = arith.constant 0 : i32
    %c0_i32_1 = arith.constant 0 : i32
    return %c0_i32, %c0_i32_0 : i32, i32
  }
  func.func @transform_2(%arg0: i32) -> (i32, i32) {
    %c0_i32 = arith.constant 0 : i32
    %c0_i32_0 = arith.constant 0 : i32
    %c0_i32_1 = arith.constant 0 : i32
    return %c0_i32, %c0_i32_0 : i32, i32
  }
  func.func @transform_3(%arg0: i32) -> (i32, i32) {
    %c0_i32 = arith.constant 0 : i32
    %c0_i32_0 = arith.constant 0 : i32
    %c0_i32_1 = arith.constant 0 : i32
    return %c0_i32, %c0_i32_0 : i32, i32
  }
  func.func @transform_4(%arg0: i32) -> (i32, i32) {
    %c0_i32 = arith.constant 0 : i32
    %c0_i32_0 = arith.constant 0 : i32
    %c0_i32_1 = arith.constant 0 : i32
    return %c0_i32, %c0_i32_0 : i32, i32
  }
  func.func @transform_5(%arg0: i32) -> (i32, i32) {
    %c0_i32 = arith.constant 0 : i32
    %c0_i32_0 = arith.constant 0 : i32
    %c0_i32_1 = arith.constant 0 : i32
    return %c0_i32, %c0_i32_0 : i32, i32
  }
  func.func @transform_6(%arg0: i32) -> (i32, i32) {
    %c0_i32 = arith.constant 0 : i32
    %c0_i32_0 = arith.constant 0 : i32
    %c0_i32_1 = arith.constant 0 : i32
    return %c0_i32, %c0_i32_0 : i32, i32
  }
  func.func @transform_7(%arg0: i32) -> (i32, i32) {
    %c0_i32 = arith.constant 0 : i32
    %c0_i32_0 = arith.constant 0 : i32
    %c0_i32_1 = arith.constant 0 : i32
    return %c0_i32, %c0_i32_0 : i32, i32
  }
  func.func @transform_8(%arg0: i32) -> (i32, i32) {
    %c0_i32 = arith.constant 0 : i32
    %c0_i32_0 = arith.constant 0 : i32
    return %arg0, %c0_i32 : i32, i32
  }
}

</mosaic_0001>

<bundles_post_ra>
// kernel: classifier_cnn_forward.1
= control target key start
LH: loop header
LB: loop body
LE: loop exit
PB: predicated region body
PF: predicated region fallthrough
CT: control target
= control target key end

     0   :  { %vm67_vm0 = vsmask.f32 7424  ;;  %vm135_vm1 = vsmask.f32 6400  ;;  %s1240_s0 = inlined_call_operand.vmem [shape: bf16[2,36,48], index: 0, kind: input, shape index: {}]   ;;  %s1241_s1 = inlined_call_operand.vmem [shape: bf16[240,128], index: 1, kind: input, shape index: {}]   ;;  %s1242_s2 = inlined_call_operand.vmem [shape: bf16[128,128], index: 2, kind: input, shape index: {}]   ;;  %s1243_s3 = inlined_call_operand.vmem [shape: f32[1,128], index: 3, kind: input, shape index: {}]   ;;  %s1244_s4 = inlined_call_operand.vmem [shape: bf16[128,128], index: 4, kind: input, shape index: {}]   ;;  %s1245_s5 = inlined_call_operand.vmem [shape: f32[1,128], index: 5, kind: input, shape index: {}]   ;;  %s1246_s6 = inlined_call_operand.vmem [shape: bf16[128,128], index: 6, kind: input, shape index: {}]   ;;  %s1247_s7 = inlined_call_operand.vmem [shape: f32[1,128], index: 7, kind: input, shape index: {}]   ;;  %s1248_s8 = inlined_call_operand.hbm [shape: f32[2,128], index: 8, kind: output, shape index: {}]  }
   0x1   :  { %v1016_v0 = vld [vmem:[%s1240_s0] sm:$0xff]  ;;  %v1021_v1 = vld [vmem:[%s1240_s0 + $0x8] sm:$0xff]  ;;  %v35_v6 = vld [vmem:[%s1240_s0 + $0x10] sm:$0x3] }
   0x2   :  { %v69_v2 = vshrl.u32 %v1016_v0, 16  ;;  %v71_v3 = vshll.u32 %v1016_v0, 16  ;;  %v76_v4 = vshll.u32 %v1021_v1, 16  ;;  %v80_v5 = vshrl.u32 %v1021_v1, 16 }
   0x3   :  { %v63_v15 = vunpack.c.l.b16 %v35_v6 }
   0x4   :  { %v73_v7 = vrot.slane %v71_v3, 1  ;;  %v78_v8 = vrot.slane %v76_v4, 1  ;;  %v136_v9 = vrot.slane %v69_v2, 1  ;;  %v137_v10 = vrot.slane %v71_v3, 2 }
   0x5   :  { %v139_v11 = vrot.slane %v80_v5, 1  ;;  %v140_v12 = vrot.slane %v76_v4, 2 }
   0x6   :  { %v74_v13 = vor.u32 %v73_v7, %v69_v2  ;;  %v138_v14 = vor.u32 %v137_v10, %v136_v9 }
   0x7   :  { %13 = vsyncpa [#allocation3], 0  ;;  %v141_v16 = vor.u32 %v140_v12, %v139_v11  ;;  %v65_v18 = vpack.c.b16 %v63_v15, %v63_v15  ;;  %s963_s11 = smov 48   ;;  %v117_v20 = vrot.slane %v1016_v0, 1  ;;  %s964_s12 = smov 16   ;;  %v118_v21 = vrot.slane %v1021_v1, 1 }
   0x8   :  { %v79_v17 = vsel %vm67_vm0, %v74_v13, %v78_v8  ;;  %v82_v24 = vor.u32 %v80_v5, %v78_v8  ;;  %vm116_vm2 = vcmask 1046528   ;;  %v171_v25 = vrot.slane %v1016_v0, 2  ;;  %v1045_v33 = vld [vmem:[%s1240_s0 + $0x14] sm:$0xff]  ;;  %s965_s15 = smov 96   ;;  %v1051_v35 = vld [vmem:[%s1240_s0 + $0x1c] sm:$0xff]  ;;  %s966_s22 = smov 64  }
   0x9   :  { %108 = vrot.lane.b32.xlu0 %v79_v17, %s963_s11  ;;  %v142_v19 = vsel %vm135_vm1, %v138_v14, %v141_v16  ;;  %v84_v22 = vshll.u32 %v65_v18, 16  ;;  %v143_v23 = vshrl.u32 %v65_v18, 16  ;;  %v172_v26 = vrot.slane %v1021_v1, 2  ;;  %v897_v36 = vld [vmem:[%s1241_s1 + $0x38] sm:$0xff]  ;;  %v904_v37 = vld [vmem:[%s1241_s1 + $0x70] sm:$0xff]  ;;  %v903_v48 = vld [vmem:[%s1241_s1 + $0x68] sm:$0xff] }
   0xa   :  { %162 = vrot.lane.b32.xlu1 %v142_v19, %s964_s12  ;;  %vm170_vm3 = vcmask 1045504   ;;  %v119_v28 = vsel %vm116_vm2, %v117_v20, %v118_v21  ;;  %v120_v34 = vrot.slane %v65_v18, 1  ;;  %v89_v39 = vshrl.u32 %v1045_v33, 16  ;;  %v40_v44 = vld [vmem:[%s1240_s0 + $0x24] sm:$0x3]  ;;  %358 = vmatpush.bf16.msra.mxu0 %v897_v36  ;;  %v896_v45 = vld [vmem:[%s1241_s1 + $0x30] sm:$0xff] }
   0xb   :  { %v86_v27 = vrot.slane %v84_v22, 1  ;;  %v145_v29 = vrot.slane %v143_v23, 1  ;;  %v146_v30 = vrot.slane %v84_v22, 2  ;;  %v173_v32 = vsel %vm170_vm3, %v171_v25, %v172_v26  ;;  %388 = vmatpush.bf16.msra.mxu1 %v904_v37  ;;  %v895_v56 = vld [vmem:[%s1241_s1 + $0x28] sm:$0xff]  ;;  %v902_v58 = vld [vmem:[%s1241_s1 + $0x60] sm:$0xff]  ;;  %v901_v5 = vld [vmem:[%s1241_s1 + $0x58] sm:$0xff] }
   0xc   :  { %v91_v40 = vshll.u32 %v1045_v33, 16  ;;  %v174_v41 = vrot.slane %v65_v18, 2  ;;  %v96_v42 = vshll.u32 %v1051_v35, 16  ;;  %v100_v43 = vshrl.u32 %v1051_v35, 16  ;;  %v894_v3 = vld [vmem:[%s1241_s1 + $0x20] sm:$0xff]  ;;  %v893_v9 = vld [vmem:[%s1241_s1 + $0x18] sm:$0xff] }
   0xd   :  { %v87_v31 = vsel %vm67_vm0, %v82_v24, %v86_v27  ;;  %v147_v38 = vor.u32 %v146_v30, %v145_v29  ;;  %v121_v46 = vsel %vm116_vm2, %v118_v21, %v120_v34  ;;  %v149_v50 = vrot.slane %v89_v39, 1  ;;  %v900_v12 = vld [vmem:[%s1241_s1 + $0x50] sm:$0xff]  ;;  %v891_v27 = vld [vmem:[%s1241_s1 + $0x8] sm:$0xff]  ;;  %v890_v29 = vld [vmem:[%s1241_s1] sm:$0xff] }
   0xe   :  { %110 = vrot.lane.b32.xlu2 %v87_v31, %s963_s11  ;;  %v93_v47 = vrot.slane %v91_v40, 1  ;;  %v64_v51 = vunpack.c.l.b16 %v40_v44  ;;  %v175_v52 = vsel %vm170_vm3, %v172_v26, %v174_v41  ;;  %v150_v53 = vrot.slane %v91_v40, 2  ;;  %359 = vmatpush.bf16.msra.mxu0 %v896_v45  ;;  %v892_v17 = vld [vmem:[%s1241_s1 + $0x10] sm:$0xff]  ;;  %v898_v30 = vld [vmem:[%s1241_s1 + $0x40] sm:$0xff] }
   0xf   :  { %v148_v49 = vsel %vm135_vm1, %v141_v16, %v147_v38  ;;  %v152_v54 = vrot.slane %v100_v43, 1  ;;  %v153_v55 = vrot.slane %v96_v42, 2  ;;  %389 = vmatpush.bf16.msra.mxu1 %v903_v48  ;;  %v122_v59 = vrot.slane %v1045_v33, 1 }
  0x10   :  { %v94_v57 = vor.u32 %v93_v47, %v89_v39  ;;  %v123_v60 = vrot.slane %v1051_v35, 1  ;;  %v66_v61 = vpack.c.b16 %v64_v51, %v64_v51  ;;  %v98_v62 = vrot.slane %v96_v42, 1 }
  0x11   :  { %127 = vrot.lane.b32.xlu0 %v119_v28, %s965_s15  ;;  %v151_v63 = vor.u32 %v150_v53, %v149_v50  ;;  %v154_v2 = vor.u32 %v153_v55, %v152_v54  ;;  %v176_v10 = vrot.slane %v1045_v33, 2  ;;  %v177_v15 = vrot.slane %v1051_v35, 2  ;;  %v899_v28 = vld [vmem:[%s1241_s1 + $0x48] sm:$0xff] }
  0x12   :  { %181 = vrot.lane.b32.xlu1 %v173_v32, %s966_s22  ;;  %360 = vmatpush.bf16.msra.mxu0 %v895_v56  ;;  %v99_v4 = vsel %vm67_vm0, %v94_v57, %v98_v62  ;;  %v124_v6 = vsel %vm116_vm2, %v122_v59, %v123_v60  ;;  %v104_v7 = vshll.u32 %v66_v61, 16  ;;  %v156_v11 = vshrl.u32 %v66_v61, 16 }
  0x13   :  { %390 = vmatpush.bf16.msra.mxu1 %v902_v58  ;;  %v155_v8 = vsel %vm135_vm1, %v151_v63, %v154_v2  ;;  %v102_v13 = vor.u32 %v100_v43, %v98_v62  ;;  %v125_v16 = vrot.slane %v66_v61, 1  ;;  %v178_v18 = vsel %vm170_vm3, %v176_v10, %v177_v15 }
  0x14   :  { %v106_v14 = vrot.slane %v104_v7, 1  ;;  %v158_v19 = vrot.slane %v156_v11, 1  ;;  %v159_v20 = vrot.slane %v104_v7, 2  ;;  %v179_v24 = vrot.slane %v66_v61, 2  ;;  %v909_v11 = vld [vmem:[%s1242_s2 + $0x20] sm:$0xff] }
  0x15   :  { %v126_v22 = vsel %vm116_vm2, %v123_v60, %v125_v16  ;;  %vm189_vm4 = vcmask 392192   ;;  %vm211_vm5 = vcmask 130048   ;;  %vm198_vm6 = vcmask 785408  }
  0x16   :  { %129 = vrot.lane.b32.xlu2 %v121_v46, %s965_s15  ;;  %361 = vmatpush.bf16.msra.mxu0 %v894_v3  ;;  %v107_v21 = vsel %vm67_vm0, %v102_v13, %v106_v14  ;;  %v160_v23 = vor.u32 %v159_v20, %v158_v19  ;;  %v180_v26 = vsel %vm170_vm3, %v177_v15, %v179_v24  ;;  %vm220_vm7 = vcmask 523264   ;;  %v908_v14 = vld [vmem:[%s1242_s2 + $0x18] sm:$0xff] }
  0x17   :  { %391 = vmatpush.bf16.msra.mxu1 %v901_v5  ;;  %vm349_vm8 = vcmask 916480   ;;  %vm462_vm9 = vcmask 1041409  }
  0x18   :  { %v161_v25 = vsel %vm135_vm1, %v154_v2, %v160_v23  ;;  %v906_v23 = vld [vmem:[%s1242_s2 + $0x8] sm:$0xff] }
  0x19   :  { %164 = vrot.lane.b32.xlu0 %v148_v49, %s964_s12 }
  0x1a   :  { %183 = vrot.lane.b32.xlu1 %v175_v52, %s966_s22  ;;  %362 = vmatpush.bf16.msra.mxu0 %v893_v9  ;;  %v910_v9 = vld [vmem:[%s1242_s2 + $0x28] sm:$0xff] }
  0x1b   :  { %392 = vmatpush.bf16.msra.mxu1 %v900_v12 }
  0x1e   :  { %112 = vrot.lane.b32.xlu2 %v99_v4, %s963_s11  ;;  %363 = vmatpush.bf16.msra.mxu0 %v892_v17  ;;  %v907_v17 = vld [vmem:[%s1242_s2 + $0x10] sm:$0xff] }
  0x1f   :  { %393 = vmatpush.bf16.msra.mxu1 %v899_v28 }
  0x21   :  { %131 = vrot.lane.b32.xlu0 %v124_v6, %s965_s15  ;;  %v912_v6 = vld [vmem:[%s1242_s2 + $0x38] sm:$0xff] }
  0x22   :  { %166 = vrot.lane.b32.xlu1 %v155_v8, %s964_s12  ;;  %364 = vmatpush.bf16.msra.mxu0 %v891_v27 }
  0x23   :  { %394 = vmatpush.bf16.msra.mxu1 %v898_v30  ;;  %514 = vmatpush.bf16.msra.mxu2 %v912_v6  ;;  %v920_v30 = vld [vmem:[%s1244_s4 + $0x38] sm:$0xff] }
  0x24   :  { %597 = vmatpush.bf16.msra.mxu3 %v920_v30  ;;  %v924_v6 = vld [vmem:[%s1246_s6 + $0x18] sm:$0xff] }
  0x26   :  { %185 = vrot.lane.b32.xlu2 %v178_v18, %s966_s22  ;;  %365 = vmatpush.bf16.msra.mxu0 %v890_v29 }
  0x29   :  { %114 = vrot.lane.b32.xlu0 %v107_v21, %s963_s11 }
  0x2a   :  { %133 = vrot.lane.b32.xlu1 %v126_v22, %s965_s15 }
  0x2e   :  { %168 = vrot.lane.b32.xlu2 %v161_v25, %s964_s12  ;;  %v905_v25 = vld [vmem:[%s1242_s2] sm:$0xff] }
  0x31   :  { %187 = vrot.lane.b32.xlu0 %v180_v26, %s966_s22  ;;  %s967_s22 = smov [#allocation2]  }
  0x32   :  { %s699_s29 = sshll.u32 %s967_s22, 4  ;;  %s700_s29 = int_to_ptr.vmem [resolvable:$true] %s699_s29 }
  0x68   :  { %v111_v38 = vpop.permute.xlu2 %110 }
  0x70   :  { %v130_v43 = vpop.permute.xlu2 %129 }
  0x78   :  { %v113_v48 = vpop.permute.xlu2 %112 }
  0x79   :  { %v195_v53 = vsel %vm189_vm4, %v1045_v33, %v113_v48 }
  0x7b   :  { %v109_v31 = vpop.permute.xlu0 %108 }
  0x7c   :  { %v163_v32 = vpop.permute.xlu1 %162  ;;  %v191_v34 = vsel %vm189_vm4, %v1016_v0, %v109_v31  ;;  %v193_v0 = vsel %vm189_vm4, %v1021_v1, %v111_v38  ;;  %v919_v31 = vld [vmem:[%s1244_s4 + $0x30] sm:$0xff] }
  0x7d   :  { %v203_v47 = vsel %vm198_vm6, %v193_v0, %v130_v43  ;;  %598 = vmatpush.bf16.msra.mxu3 %v919_v31  ;;  %v917_v0 = vld [vmem:[%s1244_s4 + $0x20] sm:$0xff] }
  0x80   :  { %v186_v52 = vpop.permute.xlu2 %185 }
  0x83   :  { %v128_v36 = vpop.permute.xlu0 %127 }
  0x84   :  { %v213_v37 = vsel %vm211_vm5, %v128_v36, %v163_v32  ;;  %v182_v39 = vpop.permute.xlu1 %181  ;;  %v200_v40 = vsel %vm198_vm6, %v191_v34, %v128_v36 }
  0x85   :  { %366 = vmatmul.bf16.vlgmr.msra.gmra.mxu0 %v200_v40  ;;  %v222_v41 = vsel %vm220_vm7, %v213_v37, %v182_v39 }
  0x86   :  { %786 = vmatmul.msk.bf16.vlgmr.msra.gmra.mxu1 %vm349_vm8, %v222_v41  ;;  %v918_v41 = vld [vmem:[%s1244_s4 + $0x28] sm:$0xff] }
  0x87   :  { %599 = vmatpush.bf16.msra.mxu3 %v918_v41 }
  0x88   :  { %v169_v56 = vpop.permute.xlu2 %168 }
  0x8b   :  { %v165_v42 = vpop.permute.xlu0 %164  ;;  %600 = vmatpush.bf16.msra.mxu3 %v917_v0 }
  0x8c   :  { %v215_v44 = vsel %vm211_vm5, %v130_v43, %v165_v42  ;;  %v184_v45 = vpop.permute.xlu1 %183 }
  0x8d   :  { %v224_v46 = vsel %vm220_vm7, %v215_v44, %v184_v45 }
  0x93   :  { %v132_v50 = vpop.permute.xlu0 %131 }
  0x94   :  { %v167_v49 = vpop.permute.xlu1 %166  ;;  %v206_v1 = vsel %vm198_vm6, %v195_v53, %v132_v50  ;;  %v915_v53 = vld [vmem:[%s1244_s4 + $0x10] sm:$0xff] }
  0x95   :  { %371 = vmatmul.bf16.gmra.mxu0 %v203_v47  ;;  %v217_v51 = vsel %vm211_vm5, %v132_v50, %v167_v49  ;;  %v916_v49 = vld [vmem:[%s1244_s4 + $0x18] sm:$0xff] }
  0x96   :  { %787 = vmatmul.msk.bf16.gmra.mxu1 %vm349_vm8, %v224_v46  ;;  %v226_v54 = vsel %vm220_vm7, %v217_v51, %v186_v52  ;;  %601 = vmatpush.bf16.msra.mxu3 %v916_v49 }
  0x9a   :  { %602 = vmatpush.bf16.msra.mxu3 %v915_v53 }
  0x9b   :  { %v115_v55 = vpop.permute.xlu0 %114 }
  0x9c   :  { %v134_v57 = vpop.permute.xlu1 %133  ;;  %v197_v60 = vsel %vm189_vm4, %v1051_v35, %v115_v55  ;;  %v911_v35 = vld [vmem:[%s1242_s2 + $0x30] sm:$0xff] }
  0x9d   :  { %v219_v58 = vsel %vm211_vm5, %v134_v57, %v169_v56  ;;  %v209_v33 = vsel %vm198_vm6, %v197_v60, %v134_v57  ;;  %515 = vmatpush.bf16.msra.mxu2 %v911_v35  ;;  %v934_v35 = vld [vmem:[%s1243_s3] ss:$0 sm:$0xff] }
  0xa1   :  { %516 = vmatpush.bf16.msra.mxu2 %v910_v9 }
  0xa3   :  { %v188_v59 = vpop.permute.xlu0 %187 }
  0xa4   :  { %v228_v61 = vsel %vm220_vm7, %v219_v58, %v188_v59 }
  0xa5   :  { %376 = vmatmul.bf16.gmra.mxu0 %v206_v1  ;;  %517 = vmatpush.bf16.msra.mxu2 %v909_v11 }
  0xa6   :  { %788 = vmatmul.msk.bf16.gmra.mxu1 %vm349_vm8, %v226_v54 }
  0xa9   :  { %518 = vmatpush.bf16.msra.mxu2 %v908_v14  ;;  %v921_v14 = vld [vmem:[%s1246_s6] sm:$0xff] }
  0xad   :  { %519 = vmatpush.bf16.msra.mxu2 %v907_v17 }
  0xb1   :  { %520 = vmatpush.bf16.msra.mxu2 %v906_v23 }
  0xb5   :  { %381 = vmatmul.bf16.gmra.mxu0 %v209_v33  ;;  %521 = vmatpush.bf16.msra.mxu2 %v905_v25 }
  0xb6   :  { %789 = vmatmul.msk.bf16.gmra.mxu1 %vm349_vm8, %v228_v61 }
 0x102   :  { %v367_v62 = vpop.f32.mrf.mxu0 }
 0x103   :  { %v396_v63 = vpop.f32.mrf.mxu1 }
 0x104   :  { %v397_v18 = vadd.f32 %v396_v63, %v367_v62  ;;  %v914_v62 = vld [vmem:[%s1244_s4 + $0x8] sm:$0xff]  ;;  %v913_v63 = vld [vmem:[%s1244_s4] sm:$0xff] }
 0x105   :  { %603 = vmatpush.bf16.msra.mxu3 %v914_v62 }
 0x109   :  { %604 = vmatpush.bf16.msra.mxu3 %v913_v63 }
 0x10a   :  { %v369_v2 = vpop.f32.mrf.mxu0 }
 0x10b   :  { %v398_v3 = vpop.f32.mrf.mxu1 }
 0x10c   :  { %v399_v15 = vadd.f32 %v398_v3, %v369_v2  ;;  %v928_v2 = vld [vmem:[%s1246_s6 + $0x38] sm:$0xff]  ;;  %v927_v3 = vld [vmem:[%s1246_s6 + $0x30] sm:$0xff] }
 0x10d   :  { %680 = vmatpush.bf16.msrb.mxu2 %v928_v2 }
 0x111   :  { %681 = vmatpush.bf16.msrb.mxu2 %v927_v3 }
 0x112   :  { %v372_v4 = vpop.f32.mrf.mxu0 }
 0x113   :  { %v401_v5 = vpop.f32.mrf.mxu1 }
 0x114   :  { %v402_v16 = vadd.f32 %v401_v5, %v372_v4  ;;  %v926_v4 = vld [vmem:[%s1246_s6 + $0x28] sm:$0xff]  ;;  %v925_v5 = vld [vmem:[%s1246_s6 + $0x20] sm:$0xff] }
 0x115   :  { %682 = vmatpush.bf16.msrb.mxu2 %v926_v4 }
 0x116   :  { %v416_v22 = vmax.f32 %v397_v18, %v402_v16 }
 0x119   :  { %683 = vmatpush.bf16.msrb.mxu2 %v925_v5 }
 0x11a   :  { %v374_v7 = vpop.f32.mrf.mxu0 }
 0x11b   :  { %v403_v8 = vpop.f32.mrf.mxu1 }
 0x11c   :  { %v404_v13 = vadd.f32 %v403_v8, %v374_v7  ;;  %v923_v7 = vld [vmem:[%s1246_s6 + $0x10] sm:$0xff] }
 0x11d   :  { %684 = vmatpush.bf16.msrb.mxu2 %v924_v6 }
 0x11e   :  { %v417_v19 = vmax.f32 %v399_v15, %v404_v13  ;;  %v922_v13 = vld [vmem:[%s1246_s6 + $0x8] sm:$0xff]  ;;  %v935_v15 = vld [vmem:[%s1245_s5] ss:$0 sm:$0xff]  ;;  %s701_s6 = sshll.u32 %s1248_s8, 4  ;;  %s702_s6 = int_to_ptr.hbm [resolvable:$true] %s701_s6 }
 0x120   :  { %v418_v24 = vmax.f32 %v416_v22, %v417_v19 }
 0x121   :  { %685 = vmatpush.bf16.msrb.mxu2 %v923_v7 }
 0x122   :  { %v377_v10 = vpop.f32.mrf.mxu0  ;;  %v419_v26 = vrot.slane %v418_v24, 4 }
 0x123   :  { %v406_v12 = vpop.f32.mrf.mxu1 }
 0x124   :  { %v420_v29 = vmax.f32 %v418_v24, %v419_v26  ;;  %v407_v38 = vadd.f32 %v406_v12, %v377_v10 }
 0x125   :  { %686 = vmatpush.bf16.msrb.mxu2 %v922_v13 }
 0x126   :  { %v421_v32 = vrot.slane %v420_v29, 2 }
 0x128   :  { %v422_v42 = vmax.f32 %v420_v29, %v421_v32 }
 0x129   :  { %687 = vmatpush.bf16.msrb.mxu2 %v921_v14 }
 0x12a   :  { %v379_v20 = vpop.f32.mrf.mxu0  ;;  %v423_v47 = vrot.slane %v422_v42, 1 }
 0x12b   :  { %v408_v21 = vpop.f32.mrf.mxu1 }
 0x12c   :  { %v409_v39 = vadd.f32 %v408_v21, %v379_v20  ;;  %v424_v51 = vmax.f32 %v422_v42, %v423_v47  ;;  %v936_v21 = vld [vmem:[%s1247_s7] ss:$0 sm:$0xff] }
 0x12e   :  { %v434_v1 = vmax.f32 %v424_v51, 0.0 }
 0x130   :  { %v436_v57 = vpack.c.bf16 %v434_v1, %v434_v1 }
 0x132   :  { %v382_v27 = vpop.f32.mrf.mxu0  ;;  %v460_v59 = vunpack.c.l.b16 %v436_v57 }
 0x133   :  { %v411_v28 = vpop.f32.mrf.mxu1 }
 0x134   :  { %v412_v34 = vadd.f32 %v411_v28, %v382_v27 }
 0x136   :  { %v425_v43 = vmax.f32 %v407_v38, %v412_v34 }
 0x13a   :  { %v384_v36 = vpop.f32.mrf.mxu0 }
 0x13b   :  { %v413_v37 = vpop.f32.mrf.mxu1 }
 0x13c   :  { %v414_v40 = vadd.f32 %v413_v37, %v384_v36 }
 0x13e   :  { %v426_v44 = vmax.f32 %v409_v39, %v414_v40 }
 0x140   :  { %v427_v45 = vmax.f32 %v425_v43, %v426_v44 }
 0x142   :  { %v428_v46 = vrot.slane %v427_v45, 4 }
 0x144   :  { %v429_v48 = vmax.f32 %v427_v45, %v428_v46 }
 0x146   :  { %v430_v50 = vrot.slane %v429_v48, 2 }
 0x148   :  { %v431_v52 = vmax.f32 %v429_v48, %v430_v50 }
 0x14a   :  { %v432_v54 = vrot.slane %v431_v52, 1 }
 0x14c   :  { %v433_v55 = vmax.f32 %v431_v52, %v432_v54 }
 0x14e   :  { %v435_v56 = vmax.f32 %v433_v55, 0.0 }
 0x150   :  { %v437_v58 = vpack.c.bf16 %v435_v56, %v435_v56 }
 0x152   :  { %v461_v60 = vunpack.c.l.b16 %v437_v58 }
 0x154   :  { %v463_v61 = vsel %vm462_vm9, %v461_v60, %v460_v59 }
 0x155   :  { %v464_v33 = vpack.c.b16 %v463_v61, %v463_v61 }
 0x157   :  { %522 = vmatmul.bf16.vlgmr.msra.gmra.mxu2 %v464_v33 }
 0x1da   :  { %v523_v8 = vpop.f32.mrf.mxu2 }
 0x1db   :  { %v524_v9 = vadd.f32 %v934_v35, %v523_v8 }
 0x1dd   :  { %v527_v10 = vmax.f32 %v524_v9, 0.0 }
 0x1df   :  { %v528_v11 = vpack.c.bf16 %v527_v10, %v527_v10 }
 0x1e1   :  { %605 = vmatmul.bf16.vlgmr.msra.gmra.mxu3 %v528_v11 }
 0x1e2   :  { %v525_v12 = vpop.f32.mrf.mxu2 }
 0x264   :  { %v606_v16 = vpop.f32.mrf.mxu3 }
 0x265   :  { %v607_v17 = vadd.f32 %v935_v15, %v606_v16 }
 0x267   :  { %v610_v18 = vmax.f32 %v607_v17, 0.0 }
 0x269   :  { %v611_v19 = vpack.c.bf16 %v610_v18, %v610_v18 }
 0x26b   :  { %688 = vmatmul.bf16.vlgmr.msrb.gmra.mxu2 %v611_v19 }
 0x26c   :  { %v608_v20 = vpop.f32.mrf.mxu3 }
 0x2ee   :  { %v689_v22 = vpop.f32.mrf.mxu2 }
 0x2ef   :  { %v690_v23 = vadd.f32 %v936_v21, %v689_v22 }
 0x2f1   :  { %693 = vst [vmem:[#allocation2] sm:$0x3] %v690_v23 }
 0x2f2   :  { %704 = dma.vmem_to_hbm [thread:$0]  %s700_s29, 32, %s702_s6, [#allocation3]  }
 0x2f6   :  { %v691_v24 = vpop.f32.mrf.mxu2 }
 0x2f7   :  { %961 = dma.done.wait [#allocation3], 32  }
 0x2f8   :  { %962 = vsyncadd [#allocation3], 4294967264 }
 0x2f9   :  { %709 = vsyncpa [#allocation3], 1 }

</bundles_post_ra>
